<compile_context>
chip_gen: v5e
topology: v5e:2x2
jax: 0.10.0
libtpu: 0.0.40
codegen_flags: <defaults>
</compile_context>

<pallas_src>
import jax
import jax.numpy as jnp
from jax import lax
from jax.experimental import pallas as pl
from jax.experimental.pallas import tpu as pltpu


_VMEM_LIMIT = 32 * 1024 * 1024  # explicit scoped-VMEM cap; safe on v5e/v6e/v7x


def _round_up(v, m):
    return ((v + m - 1) // m) * m


# ---------------- kernels ----------------

def _conv_stats_kernel(a_ref, w_ref, y_ref, sum_ref, ssq_ref, acc_ref):
    """im2col matmul (bf16 in, f32 acc) + per-M-tile per-channel sum/sumsq epilogue."""
    @pl.when(pl.program_id(1) == 0)
    def _():
        acc_ref[...] = jnp.zeros_like(acc_ref)

    acc_ref[...] += jnp.dot(a_ref[...], w_ref[...],
                            preferred_element_type=jnp.float32)

    @pl.when(pl.program_id(1) == pl.num_programs(1) - 1)
    def _():
        y = acc_ref[...]
        y_ref[...] = y
        s = jnp.sum(y, axis=0, keepdims=True)         # (1, Coutp)
        ss = jnp.sum(y * y, axis=0, keepdims=True)    # (1, Coutp)
        sum_ref[...] = jnp.broadcast_to(s, sum_ref.shape)
        ssq_ref[...] = jnp.broadcast_to(ss, ssq_ref.shape)


def _bn_relu_kernel(y_ref, scale_ref, shift_ref, o_ref):
    o_ref[...] = jnp.maximum(
        y_ref[...] * scale_ref[...] + shift_ref[...], 0.0).astype(o_ref.dtype)


def _bn_relu_residual_kernel(y_ref, scale_ref, shift_ref, res_ref, o_ref):
    o_ref[...] = (jnp.maximum(y_ref[...] * scale_ref[...] + shift_ref[...], 0.0)
                  + res_ref[...]).astype(o_ref.dtype)


# ---------------- host-side glue ----------------

def _im2col_nhwc(x_nhwc, kh, kw, stride, padding, dilation):
    """NHWC im2col -> [N*Ho*Wo, Kh*Kw*C] (channel-minor / lane-dense ordering)."""
    n, h, w, c = x_nhwc.shape
    s, p, d = stride, padding, dilation
    ho = (h + 2 * p - d * (kh - 1) - 1) // s + 1
    wo = (w + 2 * p - d * (kw - 1) - 1) // s + 1
    xp = jnp.pad(x_nhwc, ((0, 0), (p, p), (p, p), (0, 0)))
    taps = []
    for i in range(kh):
        for j in range(kw):
            taps.append(xp[:, i * d: i * d + (ho - 1) * s + 1: s,
                              j * d: j * d + (wo - 1) * s + 1: s, :])
    patches = jnp.stack(taps, axis=3)                 # [N, Ho, Wo, Kh*Kw, C]
    return patches.reshape(n * ho * wo, kh * kw * c), ho, wo


def _conv_bn_relu(x_nhwc, w, gamma, beta, *, stride=1, padding=1, dilation=1,
                  eps=1e-5, residual_nhwc=None, out_dtype=jnp.float32, tm=512):
    """One Conv2d + BatchNorm2d(batch stats) + ReLU (optionally + residual add).

    x_nhwc: [N, H, W, Cin]; w: [Cout, Cin, Kh, Kw].  Returns NHWC [N, Ho, Wo, Cout].
    Conv bias is intentionally omitted: BN's batch-mean subtraction cancels it.
    """
    n = x_nhwc.shape[0]
    cout, cin, kh, kw = w.shape

    # bf16 im2col operands for the MXU (f32 accumulation happens in-kernel).
    a, ho, wo = _im2col_nhwc(x_nhwc, kh, kw, stride, padding, dilation)
    a = a.astype(jnp.bfloat16)
    m = n * ho * wo
    k = cin * kh * kw

    # [Kh, Kw, Cin, Cout] -> [K, Cout], matching the tap ordering of the patches.
    wmat = jnp.transpose(w, (2, 3, 1, 0)).reshape(k, cout).astype(jnp.bfloat16)

    # Lane-dense channel padding (unmasked full-width stores); 256-aligned for the
    # 256-wide v6e/v7x MXU once channels are large enough.
    coutp = _round_up(cout, 256) if cout > 128 else _round_up(cout, 128)
    if coutp != cout:
        wmat = jnp.pad(wmat, ((0, 0), (0, coutp - cout)))

    # Row padding to the M tile; padded patch rows are all-zero (no conv bias), so
    # they contribute nothing to the batch statistics.
    mp = _round_up(m, tm)
    if mp != m:
        a = jnp.pad(a, ((0, mp - m), (0, 0)))
    n_mt = mp // tm

    # K tiling: 'arbitrary' reduction axis + VMEM f32 accumulator.
    if k % 256 == 0:
        tk = 256
    elif k % 128 == 0:
        tk = 128
    else:
        tk = k
    n_kt = k // tk

    y, psum, pssq = pl.pallas_call(
        _conv_stats_kernel,
        out_shape=(
            jax.ShapeDtypeStruct((mp, coutp), jnp.float32),
            jax.ShapeDtypeStruct((n_mt * 8, coutp), jnp.float32),
            jax.ShapeDtypeStruct((n_mt * 8, coutp), jnp.float32),
        ),
        grid=(n_mt, n_kt),
        in_specs=[
            pl.BlockSpec((tm, tk), lambda i, kk: (i, kk)),
            pl.BlockSpec((tk, coutp), lambda i, kk: (kk, 0)),
        ],
        out_specs=(
            pl.BlockSpec((tm, coutp), lambda i, kk: (i, 0)),
            pl.BlockSpec((8, coutp), lambda i, kk: (i, 0)),
            pl.BlockSpec((8, coutp), lambda i, kk: (i, 0)),
        ),
        scratch_shapes=[pltpu.VMEM((tm, coutp), jnp.float32)],
        compiler_params=pltpu.CompilerParams(
            dimension_semantics=("parallel", "arbitrary"),
            vmem_limit_bytes=_VMEM_LIMIT,
        ),
    )(a, wmat)

    # O(Cout) statistic finalization (biased variance == PyTorch training-mode BN).
    csum = psum.reshape(n_mt, 8, coutp)[:, 0, :].sum(axis=0)
    cssq = pssq.reshape(n_mt, 8, coutp)[:, 0, :].sum(axis=0)
    mean = csum / m
    var = jnp.maximum(cssq / m - mean * mean, 0.0)
    inv = lax.rsqrt(var + eps)
    gamma_p = jnp.pad(gamma.astype(jnp.float32), (0, coutp - cout))
    beta_p = jnp.pad(beta.astype(jnp.float32), (0, coutp - cout))
    scale = (gamma_p * inv).reshape(1, coutp)
    shift = (beta_p - mean * gamma_p * inv).reshape(1, coutp)

    # BN apply + ReLU (+ residual), tiled over M with a parallel grid axis.
    apply_in = [y, scale, shift]
    in_specs = [
        pl.BlockSpec((tm, coutp), lambda i: (i, 0)),
        pl.BlockSpec((1, coutp), lambda i: (0, 0)),
        pl.BlockSpec((1, coutp), lambda i: (0, 0)),
    ]
    if residual_nhwc is None:
        kernel = _bn_relu_kernel
    else:
        kernel = _bn_relu_residual_kernel
        res2d = residual_nhwc.reshape(m, cout).astype(jnp.float32)
        res2d = jnp.pad(res2d, ((0, mp - m), (0, coutp - cout)))
        apply_in.append(res2d)
        in_specs.append(pl.BlockSpec((tm, coutp), lambda i: (i, 0)))

    out2d = pl.pallas_call(
        kernel,
        out_shape=jax.ShapeDtypeStruct((mp, coutp), out_dtype),
        grid=(n_mt,),
        in_specs=in_specs,
        out_specs=pl.BlockSpec((tm, coutp), lambda i: (i, 0)),
        compiler_params=pltpu.CompilerParams(
            dimension_semantics=("parallel",),
            vmem_limit_bytes=_VMEM_LIMIT,
        ),
    )(*apply_in)

    return out2d[:m, :cout].reshape(n, ho, wo, cout)


def dconv2_forward(x, w1, gamma1, beta1, w2, gamma2, beta2, *, eps=1e-5):
    """DConv_2 forward.  x: [N, C, H, W] (NCHW).  Returns [N, C, H, W].

    e1 = ReLU(BN(conv1(x))); e2 = ReLU(BN(conv2(e1))); return e2 + x
    (training-mode/batch BatchNorm statistics; conv biases cancel under BN).
    """
    x = x.astype(jnp.float32)
    x_nhwc = jnp.transpose(x, (0, 2, 3, 1))       # NHWC internally (lane-dense C)
    e1 = _conv_bn_relu(x_nhwc, w1, gamma1, beta1, eps=eps,
                       out_dtype=jnp.bfloat16)    # feeds the next bf16 matmul
    e2 = _conv_bn_relu(e1, w2, gamma2, beta2, eps=eps,
                       residual_nhwc=x_nhwc, out_dtype=jnp.float32)
    return jnp.transpose(e2, (0, 3, 1, 2))        # single relayout back to NCHW


if __name__ == "__main__":
    key = jax.random.PRNGKey(0)
    keys = jax.random.split(key, 9)

    # DConv_2(channels=4) on a [2, 4, 16, 16] input (3x3 conv, stride 1, padding 1).
    N, C, H, W = 2, 4, 16, 16

    x = jax.random.normal(keys[0], (N, C, H, W), jnp.float32)
    w1 = 0.1 * jax.random.normal(keys[1], (C, C, 3, 3), jnp.float32)
    b1 = 0.1 * jax.random.normal(keys[2], (C,), jnp.float32)   # cancels under BN
    g1 = 1.0 + 0.1 * jax.random.normal(keys[3], (C,), jnp.float32)
    be1 = 0.1 * jax.random.normal(keys[4], (C,), jnp.float32)
    w2 = 0.1 * jax.random.normal(keys[5], (C, C, 3, 3), jnp.float32)
    b2 = 0.1 * jax.random.normal(keys[6], (C,), jnp.float32)   # cancels under BN
    g2 = 1.0 + 0.1 * jax.random.normal(keys[7], (C,), jnp.float32)
    be2 = 0.1 * jax.random.normal(keys[8], (C,), jnp.float32)

    out = dconv2_forward(x, w1, g1, be1, w2, g2, be2)
    out = jax.block_until_ready(out)

    # Pure-JAX reference: (Conv2d WITH bias -> training-mode BatchNorm2d -> ReLU) x2 + skip.
    def ref_layer(inp, w, b, g, be, eps=1e-5):
        y = lax.conv_general_dilated(
            inp, w, window_strides=(1, 1), padding=((1, 1), (1, 1)),
            dimension_numbers=("NCHW", "OIHW", "NCHW"),
            precision=lax.Precision.HIGHEST,
        ) + b.reshape(1, -1, 1, 1)
        mean = y.mean(axis=(0, 2, 3), keepdims=True)
        var = y.var(axis=(0, 2, 3), keepdims=True)           # biased
        return jnp.maximum(
            (y - mean) * lax.rsqrt(var + eps) * g.reshape(1, -1, 1, 1)
            + be.reshape(1, -1, 1, 1),
            0.0,
        )

    ref = ref_layer(ref_layer(x, w1, b1, g1, be1), w2, b2, g2, be2) + x

    assert out.shape == ref.shape == (N, C, H, W)
    err = float(jnp.max(jnp.abs(out - ref)))
    # Tolerance sized for two chained bf16-operand MXU matmuls vs an f32 HIGHEST
    # reference (the reference includes conv biases, which cancel under batch-stat BN).
    assert err < 5e-2, f"mismatch vs reference: {err}"
    print("KERNEL_OK")
</pallas_src>

<mosaic_0001>
module attributes {stable_mosaic.version = 11 : i64} {
  func.func @_conv_stats_kernel(%arg0: i32, %arg1: i32, %arg2: memref<512x36xbf16, #tpu.memory_space<vmem>>, %arg3: memref<36x128xbf16, #tpu.memory_space<vmem>>, %arg4: memref<512x128xf32, #tpu.memory_space<vmem>>, %arg5: memref<8x128xf32, #tpu.memory_space<vmem>>, %arg6: memref<8x128xf32, #tpu.memory_space<vmem>>, %arg7: memref<512x128xf32, #tpu.memory_space<vmem>>) attributes {dimension_semantics = [#tpu.dimension_semantics<parallel>, #tpu.dimension_semantics<arbitrary>], iteration_bounds = array<i64: 1, 1>, scalar_prefetch = 0 : i64, scratch_operands = 1 : i64, tpu.core_type = #tpu.core_type<tc>, window_params = [{transform_indices = @transform_0, window_bounds = array<i64: 512, 36>}, {transform_indices = @transform_1, window_bounds = array<i64: 36, 128>}, {transform_indices = @transform_2, window_bounds = array<i64: 512, 128>}, {transform_indices = @transform_3, window_bounds = array<i64: 8, 128>}, {transform_indices = @transform_4, window_bounds = array<i64: 8, 128>}]} {
    %c0_i32 = arith.constant 0 : i32
    %0 = arith.cmpi eq, %arg1, %c0_i32 : i32
    %1 = arith.extui %0 : i1 to i32
    %c0_i32_0 = arith.constant 0 : i32
    %2 = arith.cmpi ne, %1, %c0_i32_0 : i32
    scf.if %2 {
      %cst_10 = arith.constant 0.000000e+00 : f32
      %12 = vector.broadcast %cst_10 : f32 to vector<512x128xf32>
      %c0_11 = arith.constant 0 : index
      %c0_12 = arith.constant 0 : index
      %13 = vector.load %arg7[%c0_11, %c0_12] : memref<512x128xf32, #tpu.memory_space<vmem>>, vector<512x128xf32>
      tpu.vector_store %arg7[%c0_11, %c0_12], %12 {strides = array<i32>} : memref<512x128xf32, #tpu.memory_space<vmem>>, vector<512x128xf32>,
    } else {
    }
    %c0 = arith.constant 0 : index
    %c0_1 = arith.constant 0 : index
    %3 = vector.load %arg7[%c0, %c0_1] : memref<512x128xf32, #tpu.memory_space<vmem>>, vector<512x128xf32>
    %c0_2 = arith.constant 0 : index
    %c0_3 = arith.constant 0 : index
    %4 = vector.load %arg2[%c0_2, %c0_3] : memref<512x36xbf16, #tpu.memory_space<vmem>>, vector<512x36xbf16>
    %c0_4 = arith.constant 0 : index
    %c0_5 = arith.constant 0 : index
    %5 = vector.load %arg3[%c0_4, %c0_5] : memref<36x128xbf16, #tpu.memory_space<vmem>>, vector<36x128xbf16>
    %cst = arith.constant dense<0.000000e+00> : vector<512x128xf32>
    %6 = tpu.matmul %4, %5, %cst {dimension_numbers = #tpu.dot_dimension_numbers<[1], [0], [0], [1], [0, 0, 1, 1], [], []>} : vector<512x36xbf16>, vector<36x128xbf16>, vector<512x128xf32> -> vector<512x128xf32>
    %7 = arith.addf %3, %6 : vector<512x128xf32>
    %c0_6 = arith.constant 0 : index
    %c0_7 = arith.constant 0 : index
    %8 = vector.load %arg7[%c0_6, %c0_7] : memref<512x128xf32, #tpu.memory_space<vmem>>, vector<512x128xf32>
    tpu.vector_store %arg7[%c0_6, %c0_7], %7 {strides = array<i32>} : memref<512x128xf32, #tpu.memory_space<vmem>>, vector<512x128xf32>,
    %c0_i32_8 = arith.constant 0 : i32
    %9 = arith.cmpi eq, %arg1, %c0_i32_8 : i32
    %10 = arith.extui %9 : i1 to i32
    %c0_i32_9 = arith.constant 0 : i32
    %11 = arith.cmpi ne, %10, %c0_i32_9 : i32
    scf.if %11 {
      %c0_10 = arith.constant 0 : index
      %c0_11 = arith.constant 0 : index
      %12 = vector.load %arg7[%c0_10, %c0_11] : memref<512x128xf32, #tpu.memory_space<vmem>>, vector<512x128xf32>
      %c0_12 = arith.constant 0 : index
      %c0_13 = arith.constant 0 : index
      %13 = vector.load %arg4[%c0_12, %c0_13] : memref<512x128xf32, #tpu.memory_space<vmem>>, vector<512x128xf32>
      tpu.vector_store %arg4[%c0_12, %c0_13], %12 {strides = array<i32>} : memref<512x128xf32, #tpu.memory_space<vmem>>, vector<512x128xf32>,
      %cst_14 = arith.constant dense<0.000000e+00> : vector<128xf32>
      %14 = vector.multi_reduction <add>, %12, %cst_14 [0] : vector<512x128xf32> to vector<128xf32>
      %15 = vector.shape_cast %14 : vector<128xf32> to vector<1x128xf32>
      %16 = arith.mulf %12, %12 : vector<512x128xf32>
      %cst_15 = arith.constant dense<0.000000e+00> : vector<128xf32>
      %17 = vector.multi_reduction <add>, %16, %cst_15 [0] : vector<512x128xf32> to vector<128xf32>
      %18 = vector.shape_cast %17 : vector<128xf32> to vector<1x128xf32>
      %19 = vector.shape_cast %15 : vector<1x128xf32> to vector<1x128xf32>
      %20 = vector.broadcast %19 : vector<1x128xf32> to vector<8x128xf32>
      %c0_16 = arith.constant 0 : index
      %c0_17 = arith.constant 0 : index
      %21 = vector.load %arg5[%c0_16, %c0_17] : memref<8x128xf32, #tpu.memory_space<vmem>>, vector<8x128xf32>
      tpu.vector_store %arg5[%c0_16, %c0_17], %20 {strides = array<i32>} : memref<8x128xf32, #tpu.memory_space<vmem>>, vector<8x128xf32>,
      %22 = vector.shape_cast %18 : vector<1x128xf32> to vector<1x128xf32>
      %23 = vector.broadcast %22 : vector<1x128xf32> to vector<8x128xf32>
      %c0_18 = arith.constant 0 : index
      %c0_19 = arith.constant 0 : index
      %24 = vector.load %arg6[%c0_18, %c0_19] : memref<8x128xf32, #tpu.memory_space<vmem>>, vector<8x128xf32>
      tpu.vector_store %arg6[%c0_18, %c0_19], %23 {strides = array<i32>} : memref<8x128xf32, #tpu.memory_space<vmem>>, vector<8x128xf32>,
    } else {
    }
    return
  }
  func.func @transform_0(%arg0: i32, %arg1: i32) -> (i32, i32) {
    %c0_i32 = arith.constant 0 : i32
    return %arg0, %arg1 : i32, i32
  }
  func.func @transform_1(%arg0: i32, %arg1: i32) -> (i32, i32) {
    %c0_i32 = arith.constant 0 : i32
    %c0_i32_0 = arith.constant 0 : i32
    return %arg1, %c0_i32 : i32, i32
  }
  func.func @transform_2(%arg0: i32, %arg1: i32) -> (i32, i32) {
    %c0_i32 = arith.constant 0 : i32
    %c0_i32_0 = arith.constant 0 : i32
    return %arg0, %c0_i32 : i32, i32
  }
  func.func @transform_3(%arg0: i32, %arg1: i32) -> (i32, i32) {
    %c0_i32 = arith.constant 0 : i32
    %c0_i32_0 = arith.constant 0 : i32
    return %arg0, %c0_i32 : i32, i32
  }
  func.func @transform_4(%arg0: i32, %arg1: i32) -> (i32, i32) {
    %c0_i32 = arith.constant 0 : i32
    %c0_i32_0 = arith.constant 0 : i32
    return %arg0, %c0_i32 : i32, i32
  }
}

</mosaic_0001>

<bundles_post_ra>
// kernel: tpu_custom_call.1
= control target key start
LH: loop header
LB: loop body
LE: loop exit
PB: predicated region body
PF: predicated region fallthrough
CT: control target
= control target key end

     0   :  { %10 = vsyncpa [#allocation4], 0  ;;  %vm490_vm0 = vcmask 1041408   ;;  %s1937_s0 = inlined_call_operand.vmem [shape: bf16[512,36], index: 0, kind: input, shape index: {}]   ;;  %s1938_s1 = inlined_call_operand.vmem [shape: bf16[36,128], index: 1, kind: input, shape index: {}]   ;;  %s1939_s2 = inlined_call_operand.hbm [shape: f32[512,128], index: 2, kind: output, shape index: {0}]   ;;  %s1940_s3 = inlined_call_operand.hbm [shape: f32[8,128], index: 3, kind: output, shape index: {1}]   ;;  %s1941_s4 = inlined_call_operand.hbm [shape: f32[8,128], index: 4, kind: output, shape index: {2}]  }
   0x1   :  { %v217_v0 = vld [vmem:[%s1938_s1 + $0x10] sm:$0x3] }
   0x2   :  { %v387_v1 = vunpack.c.l.b16 %v217_v0 }
   0x3   :  { %11 = vsyncpa [#allocation6], 0  ;;  %v1376_v4 = vld [vmem:[%s1938_s1 + $0x8] sm:$0xff]  ;;  %v1375_v5 = vld [vmem:[%s1938_s1] sm:$0xff]  ;;  %vm393_vm1 = vcmask 293888   ;;  %s1132_s7 = sshll.u32 %s1939_s2, 4  ;;  %s1133_s7 = int_to_ptr.hbm [resolvable:$true] %s1132_s7 }
   0x4   :  { %v390_v2 = vpack.c.b16 %v387_v1, %v387_v1  ;;  %v1343_v6 = vld [vmem:[%s1937_s0] sm:$0xff]  ;;  %v1344_v8 = vld [vmem:[%s1937_s0 + $0x8] sm:$0xff]  ;;  %v1345_v11 = vld [vmem:[%s1937_s0 + $0x10] sm:$0xff]  ;;  %s1468_s2 = smov 128   ;;  %s1469_s8 = smov 8  }
   0x5   :  { %v1351_v7 = vld [vmem:[%s1937_s0 + $0x40] sm:$0xff]  ;;  %v1352_v9 = vld [vmem:[%s1937_s0 + $0x48] sm:$0xff]  ;;  %v1353_v12 = vld [vmem:[%s1937_s0 + $0x50] sm:$0xff]  ;;  %s1470_s9 = smov [#allocation5]   ;;  %s1146_s13 = sshll.u32 %s1940_s3, 4  ;;  %s1147_s13 = int_to_ptr.hbm [resolvable:$true] %s1146_s13 }
   0x6   :  { %v492_v3 = vsel %vm490_vm0, %v390_v2, 0  ;;  %v1359_v10 = vld [vmem:[%s1937_s0 + $0x80] sm:$0xff]  ;;  %v1360_v13 = vld [vmem:[%s1937_s0 + $0x88] sm:$0xff]  ;;  %v1346_v14 = vld [vmem:[%s1937_s0 + $0x18] sm:$0xff]  ;;  %s1144_s10 = sshll.u32 %s1470_s9, 4  ;;  %s1471_s14 = smov [#allocation7]   ;;  %s1145_s10 = int_to_ptr.vmem [resolvable:$true] %s1144_s10 }
   0x7   :  { %499 = vmatpush.bf16.msra.mxu0 %v492_v3  ;;  %1377 = vmatpush.bf16.msra.mxu1 %v492_v3  ;;  %v1354_v15 = vld [vmem:[%s1937_s0 + $0x58] sm:$0xff]  ;;  %v1361_v16 = vld [vmem:[%s1937_s0 + $0x90] sm:$0xff]  ;;  %v1367_v17 = vld [vmem:[%s1937_s0 + $0xc0] sm:$0xff]  ;;  %s1155_s15 = sshll.u32 %s1471_s14, 4  ;;  %s1157_s18 = sshll.u32 %s1941_s4, 4  ;;  %s1156_s15 = int_to_ptr.vmem [resolvable:$true] %s1155_s15  ;;  %s1158_s18 = int_to_ptr.hbm [resolvable:$true] %s1157_s18 }
   0x8   :  { %1378 = vmatpush.bf16.msra.mxu2 %v492_v3  ;;  %1379 = vmatpush.bf16.msra.mxu3 %v492_v3  ;;  %v1347_v18 = vld [vmem:[%s1937_s0 + $0x20] sm:$0xff]  ;;  %v1362_v20 = vld [vmem:[%s1937_s0 + $0x98] sm:$0xff]  ;;  %v1368_v21 = vld [vmem:[%s1937_s0 + $0xc8] sm:$0xff] }
   0x9   :  { %v1355_v19 = vld [vmem:[%s1937_s0 + $0x60] sm:$0xff]  ;;  %v1348_v22 = vld [vmem:[%s1937_s0 + $0x28] sm:$0xff]  ;;  %v1369_v25 = vld [vmem:[%s1937_s0 + $0xd0] sm:$0xff] }
   0xa   :  { %v1356_v23 = vld [vmem:[%s1937_s0 + $0x68] sm:$0xff]  ;;  %v1363_v24 = vld [vmem:[%s1937_s0 + $0xa0] sm:$0xff]  ;;  %v1349_v26 = vld [vmem:[%s1937_s0 + $0x30] sm:$0xff] }
   0xb   :  { %500 = vmatpush.bf16.msra.mxu0 %v1376_v4  ;;  %1380 = vmatpush.bf16.msra.mxu1 %v1376_v4  ;;  %v1357_v27 = vld [vmem:[%s1937_s0 + $0x70] sm:$0xff]  ;;  %v1364_v28 = vld [vmem:[%s1937_s0 + $0xa8] sm:$0xff]  ;;  %v1370_v29 = vld [vmem:[%s1937_s0 + $0xd8] sm:$0xff] }
   0xc   :  { %1381 = vmatpush.bf16.msra.mxu2 %v1376_v4  ;;  %1382 = vmatpush.bf16.msra.mxu3 %v1376_v4  ;;  %v1350_v30 = vld [vmem:[%s1937_s0 + $0x38] sm:$0xff]  ;;  %v1365_v32 = vld [vmem:[%s1937_s0 + $0xb0] sm:$0xff]  ;;  %v1371_v33 = vld [vmem:[%s1937_s0 + $0xe0] sm:$0xff] }
   0xd   :  { %v1358_v31 = vld [vmem:[%s1937_s0 + $0x78] sm:$0xff]  ;;  %v1372_v37 = vld [vmem:[%s1937_s0 + $0xe8] sm:$0xff]  ;;  %v1373_v49 = vld [vmem:[%s1937_s0 + $0xf0] sm:$0xff] }
   0xe   :  { %v1366_v36 = vld [vmem:[%s1937_s0 + $0xb8] sm:$0xff] }
   0xf   :  { %501 = vmatpush.bf16.msra.mxu0 %v1375_v5  ;;  %1383 = vmatpush.bf16.msra.mxu1 %v1375_v5  ;;  %v1374_v62 = vld [vmem:[%s1937_s0 + $0xf8] sm:$0xff]  ;;  %s1467_s0 = smov [#allocation3]  }
  0x10   :  { %1384 = vmatpush.bf16.msra.mxu2 %v1375_v5  ;;  %1385 = vmatpush.bf16.msra.mxu3 %v1375_v5  ;;  %s1130_s30 = sshll.u32 %s1467_s0, 4  ;;  %s1131_s30 = int_to_ptr.vmem [resolvable:$true] %s1130_s30 }
  0x12   :  { %1311 = vmatmul.msk.bf16.vlgmr.msra.gmra.mxu0 %vm393_vm1, %v1343_v6  ;;  %1319 = vmatmul.msk.bf16.vlgmr.msra.gmra.mxu1 %vm393_vm1, %v1351_v7 }
  0x13   :  { %1327 = vmatmul.msk.bf16.vlgmr.msra.gmra.mxu2 %vm393_vm1, %v1359_v10  ;;  %1335 = vmatmul.msk.bf16.vlgmr.msra.gmra.mxu3 %vm393_vm1, %v1367_v17 }
  0x22   :  { %1312 = vmatmul.msk.bf16.gmra.mxu0 %vm393_vm1, %v1344_v8  ;;  %1320 = vmatmul.msk.bf16.gmra.mxu1 %vm393_vm1, %v1352_v9 }
  0x23   :  { %1328 = vmatmul.msk.bf16.gmra.mxu2 %vm393_vm1, %v1360_v13  ;;  %1336 = vmatmul.msk.bf16.gmra.mxu3 %vm393_vm1, %v1368_v21 }
  0x32   :  { %1313 = vmatmul.msk.bf16.gmra.mxu0 %vm393_vm1, %v1345_v11  ;;  %1321 = vmatmul.msk.bf16.gmra.mxu1 %vm393_vm1, %v1353_v12 }
  0x33   :  { %1329 = vmatmul.msk.bf16.gmra.mxu2 %vm393_vm1, %v1361_v16  ;;  %1337 = vmatmul.msk.bf16.gmra.mxu3 %vm393_vm1, %v1369_v25 }
  0x42   :  { %1314 = vmatmul.msk.bf16.gmra.mxu0 %vm393_vm1, %v1346_v14  ;;  %1322 = vmatmul.msk.bf16.gmra.mxu1 %vm393_vm1, %v1354_v15 }
  0x43   :  { %1330 = vmatmul.msk.bf16.gmra.mxu2 %vm393_vm1, %v1362_v20  ;;  %1338 = vmatmul.msk.bf16.gmra.mxu3 %vm393_vm1, %v1370_v29 }
  0x52   :  { %1315 = vmatmul.msk.bf16.gmra.mxu0 %vm393_vm1, %v1347_v18  ;;  %1323 = vmatmul.msk.bf16.gmra.mxu1 %vm393_vm1, %v1355_v19 }
  0x53   :  { %1331 = vmatmul.msk.bf16.gmra.mxu2 %vm393_vm1, %v1363_v24  ;;  %1339 = vmatmul.msk.bf16.gmra.mxu3 %vm393_vm1, %v1371_v33 }
  0x62   :  { %1316 = vmatmul.msk.bf16.gmra.mxu0 %vm393_vm1, %v1348_v22  ;;  %1324 = vmatmul.msk.bf16.gmra.mxu1 %vm393_vm1, %v1356_v23 }
  0x63   :  { %1332 = vmatmul.msk.bf16.gmra.mxu2 %vm393_vm1, %v1364_v28  ;;  %1340 = vmatmul.msk.bf16.gmra.mxu3 %vm393_vm1, %v1372_v37 }
  0x72   :  { %1317 = vmatmul.msk.bf16.gmra.mxu0 %vm393_vm1, %v1349_v26  ;;  %1325 = vmatmul.msk.bf16.gmra.mxu1 %vm393_vm1, %v1357_v27 }
  0x73   :  { %1333 = vmatmul.msk.bf16.gmra.mxu2 %vm393_vm1, %v1365_v32  ;;  %1341 = vmatmul.msk.bf16.gmra.mxu3 %vm393_vm1, %v1373_v49 }
  0x82   :  { %1318 = vmatmul.msk.bf16.gmra.mxu0 %vm393_vm1, %v1350_v30  ;;  %1326 = vmatmul.msk.bf16.gmra.mxu1 %vm393_vm1, %v1358_v31 }
  0x83   :  { %1334 = vmatmul.msk.bf16.gmra.mxu2 %vm393_vm1, %v1366_v36  ;;  %1342 = vmatmul.msk.bf16.gmra.mxu3 %vm393_vm1, %v1374_v62 }
  0x8f   :  { %v503_v34 = vpop.f32.mrf.mxu0  ;;  %v1618_v35 = vpop.f32.mrf.mxu1 }
  0x90   :  { %858 = vst [vmem:[#allocation3] sm:$0xff] %v503_v34  ;;  %v991_v40 = vmul.f32 %v503_v34, %v503_v34 }
  0x91   :  { %874 = vst [vmem:[#allocation3 + $0x80] sm:$0xff] %v1618_v35 }
  0x96   :  { %v1641_v54 = vpop.f32.mrf.mxu2  ;;  %v1675_v8 = vpop.f32.mrf.mxu3 }
  0x97   :  { %v505_v38 = vpop.f32.mrf.mxu0  ;;  %v1629_v39 = vpop.f32.mrf.mxu1  ;;  %890 = vst [vmem:[#allocation3 + $0x100] sm:$0xff] %v1641_v54 }
  0x98   :  { %859 = vst [vmem:[#allocation3 + $0x8] sm:$0xff] %v505_v38  ;;  %v922_v41 = vadd.f32 %v505_v38, %v503_v34  ;;  %v992_v42 = vmul.f32 %v505_v38, %v505_v38 }
  0x99   :  { %875 = vst [vmem:[#allocation3 + $0x88] sm:$0xff] %v1629_v39 }
  0x9a   :  { %v1055_v43 = vadd.f32 %v992_v42, %v991_v40  ;;  %906 = vst [vmem:[#allocation3 + $0x180] sm:$0xff] %v1675_v8 }
  0x9e   :  { %v1649_v60 = vpop.f32.mrf.mxu2  ;;  %v1684_v12 = vpop.f32.mrf.mxu3 }
  0x9f   :  { %v508_v44 = vpop.f32.mrf.mxu0  ;;  %v1632_v45 = vpop.f32.mrf.mxu1  ;;  %891 = vst [vmem:[#allocation3 + $0x108] sm:$0xff] %v1649_v60 }
  0xa0   :  { %860 = vst [vmem:[#allocation3 + $0x10] sm:$0xff] %v508_v44  ;;  %v923_v46 = vadd.f32 %v922_v41, %v508_v44  ;;  %v993_v47 = vmul.f32 %v508_v44, %v508_v44 }
  0xa1   :  { %876 = vst [vmem:[#allocation3 + $0x90] sm:$0xff] %v1632_v45 }
  0xa2   :  { %v1056_v48 = vadd.f32 %v1055_v43, %v993_v47  ;;  %907 = vst [vmem:[#allocation3 + $0x188] sm:$0xff] %v1684_v12 }
  0xa6   :  { %v1661_v1 = vpop.f32.mrf.mxu2  ;;  %v1693_v16 = vpop.f32.mrf.mxu3 }
  0xa7   :  { %v510_v50 = vpop.f32.mrf.mxu0  ;;  %v1639_v51 = vpop.f32.mrf.mxu1  ;;  %892 = vst [vmem:[#allocation3 + $0x110] sm:$0xff] %v1661_v1 }
  0xa8   :  { %861 = vst [vmem:[#allocation3 + $0x18] sm:$0xff] %v510_v50  ;;  %v924_v52 = vadd.f32 %v923_v46, %v510_v50  ;;  %v994_v53 = vmul.f32 %v510_v50, %v510_v50 }
  0xa9   :  { %877 = vst [vmem:[#allocation3 + $0x98] sm:$0xff] %v1639_v51 }
  0xaa   :  { %v1057_v55 = vadd.f32 %v1056_v48, %v994_v53  ;;  %908 = vst [vmem:[#allocation3 + $0x190] sm:$0xff] %v1693_v16 }
  0xae   :  { %v1667_v4 = vpop.f32.mrf.mxu2  ;;  %v1702_v20 = vpop.f32.mrf.mxu3 }
  0xaf   :  { %v513_v56 = vpop.f32.mrf.mxu0  ;;  %v1645_v57 = vpop.f32.mrf.mxu1  ;;  %893 = vst [vmem:[#allocation3 + $0x118] sm:$0xff] %v1667_v4 }
  0xb0   :  { %862 = vst [vmem:[#allocation3 + $0x20] sm:$0xff] %v513_v56  ;;  %v1647_v58 = vadd.f32 %v924_v52, %v513_v56  ;;  %v995_v59 = vmul.f32 %v513_v56, %v513_v56 }
  0xb1   :  { %878 = vst [vmem:[#allocation3 + $0xa0] sm:$0xff] %v1645_v57 }
  0xb2   :  { %v1652_v61 = vadd.f32 %v1057_v55, %v995_v59  ;;  %909 = vst [vmem:[#allocation3 + $0x198] sm:$0xff] %v1702_v20 }
  0xb6   :  { %v1673_v7 = vpop.f32.mrf.mxu2  ;;  %v1711_v24 = vpop.f32.mrf.mxu3 }
  0xb7   :  { %v515_v63 = vpop.f32.mrf.mxu0  ;;  %v1659_v0 = vpop.f32.mrf.mxu1  ;;  %894 = vst [vmem:[#allocation3 + $0x120] sm:$0xff] %v1673_v7 }
  0xb8   :  { %863 = vst [vmem:[#allocation3 + $0x28] sm:$0xff] %v515_v63  ;;  %v996_v29 = vmul.f32 %v515_v63, %v515_v63  ;;  %v926_v30 = vadd.f32 %v1647_v58, %v515_v63 }
  0xb9   :  { %879 = vst [vmem:[#allocation3 + $0xa8] sm:$0xff] %v1659_v0 }
  0xba   :  { %910 = vst [vmem:[#allocation3 + $0x1a0] sm:$0xff] %v1711_v24  ;;  %v1059_v32 = vadd.f32 %v1652_v61, %v996_v29 }
  0xbe   :  { %v1682_v11 = vpop.f32.mrf.mxu2  ;;  %v1720_v28 = vpop.f32.mrf.mxu3 }
  0xbf   :  { %v518_v2 = vpop.f32.mrf.mxu0  ;;  %v1665_v3 = vpop.f32.mrf.mxu1  ;;  %895 = vst [vmem:[#allocation3 + $0x128] sm:$0xff] %v1682_v11 }
  0xc0   :  { %864 = vst [vmem:[#allocation3 + $0x30] sm:$0xff] %v518_v2  ;;  %v997_v31 = vmul.f32 %v518_v2, %v518_v2  ;;  %v927_v33 = vadd.f32 %v926_v30, %v518_v2 }
  0xc1   :  { %880 = vst [vmem:[#allocation3 + $0xb0] sm:$0xff] %v1665_v3 }
  0xc2   :  { %911 = vst [vmem:[#allocation3 + $0x1a8] sm:$0xff] %v1720_v28  ;;  %v1060_v38 = vadd.f32 %v1059_v32, %v997_v31 }
  0xc6   :  { %v1691_v15 = vpop.f32.mrf.mxu2  ;;  %v1731_v43 = vpop.f32.mrf.mxu3 }
  0xc7   :  { %v520_v5 = vpop.f32.mrf.mxu0  ;;  %v1671_v6 = vpop.f32.mrf.mxu1  ;;  %896 = vst [vmem:[#allocation3 + $0x130] sm:$0xff] %v1691_v15 }
  0xc8   :  { %865 = vst [vmem:[#allocation3 + $0x38] sm:$0xff] %v520_v5  ;;  %v998_v34 = vmul.f32 %v520_v5, %v520_v5  ;;  %v928_v40 = vadd.f32 %v927_v33, %v520_v5 }
  0xc9   :  { %881 = vst [vmem:[#allocation3 + $0xb8] sm:$0xff] %v1671_v6 }
  0xca   :  { %v1061_v44 = vadd.f32 %v1060_v38, %v998_v34  ;;  %912 = vst [vmem:[#allocation3 + $0x1b0] sm:$0xff] %v1731_v43 }
  0xce   :  { %v1700_v19 = vpop.f32.mrf.mxu2  ;;  %v1740_v2 = vpop.f32.mrf.mxu3 }
  0xcf   :  { %v523_v9 = vpop.f32.mrf.mxu0  ;;  %v1680_v10 = vpop.f32.mrf.mxu1  ;;  %897 = vst [vmem:[#allocation3 + $0x138] sm:$0xff] %v1700_v19 }
  0xd0   :  { %866 = vst [vmem:[#allocation3 + $0x40] sm:$0xff] %v523_v9  ;;  %v999_v41 = vmul.f32 %v523_v9, %v523_v9  ;;  %v929_v46 = vadd.f32 %v928_v40, %v523_v9 }
  0xd1   :  { %882 = vst [vmem:[#allocation3 + $0xc0] sm:$0xff] %v1680_v10 }
  0xd2   :  { %v1062_v48 = vadd.f32 %v1061_v44, %v999_v41  ;;  %913 = vst [vmem:[#allocation3 + $0x1b8] sm:$0xff] %v1740_v2  ;;  %v1007_v44 = vmul.f32 %v1618_v35, %v1618_v35 }
  0xd6   :  { %v1709_v23 = vpop.f32.mrf.mxu2 }
  0xd7   :  { %v525_v13 = vpop.f32.mrf.mxu0  ;;  %v1689_v14 = vpop.f32.mrf.mxu1  ;;  %898 = vst [vmem:[#allocation3 + $0x140] sm:$0xff] %v1709_v23 }
  0xd8   :  { %867 = vst [vmem:[#allocation3 + $0x48] sm:$0xff] %v525_v13  ;;  %v1000_v47 = vmul.f32 %v525_v13, %v525_v13  ;;  %v930_v49 = vadd.f32 %v929_v46, %v525_v13 }
  0xd9   :  { %883 = vst [vmem:[#allocation3 + $0xc8] sm:$0xff] %v1689_v14 }
  0xda   :  { %v1063_v52 = vadd.f32 %v1062_v48, %v1000_v47  ;;  %v1008_v47 = vmul.f32 %v1629_v39, %v1629_v39 }
  0xde   :  { %v1718_v27 = vpop.f32.mrf.mxu2 }
  0xdf   :  { %v528_v17 = vpop.f32.mrf.mxu0  ;;  %v1698_v18 = vpop.f32.mrf.mxu1  ;;  %899 = vst [vmem:[#allocation3 + $0x148] sm:$0xff] %v1718_v27 }
  0xe0   :  { %868 = vst [vmem:[#allocation3 + $0x50] sm:$0xff] %v528_v17  ;;  %v1001_v50 = vmul.f32 %v528_v17, %v528_v17  ;;  %v931_v53 = vadd.f32 %v930_v49, %v528_v17 }
  0xe1   :  { %884 = vst [vmem:[#allocation3 + $0xd0] sm:$0xff] %v1698_v18 }
  0xe2   :  { %v1064_v59 = vadd.f32 %v1063_v52, %v1001_v50  ;;  %v1009_v50 = vmul.f32 %v1632_v45, %v1632_v45 }
  0xe6   :  { %v1729_v42 = vpop.f32.mrf.mxu2 }
  0xe7   :  { %v530_v21 = vpop.f32.mrf.mxu0  ;;  %v1707_v22 = vpop.f32.mrf.mxu1  ;;  %900 = vst [vmem:[#allocation3 + $0x150] sm:$0xff] %v1729_v42 }
  0xe8   :  { %869 = vst [vmem:[#allocation3 + $0x58] sm:$0xff] %v530_v21  ;;  %v1002_v55 = vmul.f32 %v530_v21, %v530_v21  ;;  %v932_v61 = vadd.f32 %v931_v53, %v530_v21 }
  0xe9   :  { %885 = vst [vmem:[#allocation3 + $0xd8] sm:$0xff] %v1707_v22 }
  0xea   :  { %v1065_v5 = vadd.f32 %v1064_v59, %v1002_v55 }
  0xee   :  { %v1738_v63 = vpop.f32.mrf.mxu2 }
  0xef   :  { %v533_v25 = vpop.f32.mrf.mxu0  ;;  %v1716_v26 = vpop.f32.mrf.mxu1  ;;  %901 = vst [vmem:[#allocation3 + $0x158] sm:$0xff] %v1738_v63 }
  0xf0   :  { %870 = vst [vmem:[#allocation3 + $0x60] sm:$0xff] %v533_v25  ;;  %v1003_v62 = vmul.f32 %v533_v25, %v533_v25  ;;  %v933_v9 = vadd.f32 %v932_v61, %v533_v25  ;;  %v1749_v25 = vpop.f32.mrf.mxu3 }
  0xf1   :  { %886 = vst [vmem:[#allocation3 + $0xe0] sm:$0xff] %v1716_v26 }
  0xf2   :  { %v1066_v17 = vadd.f32 %v1065_v5, %v1003_v62  ;;  %914 = vst [vmem:[#allocation3 + $0x1c0] sm:$0xff] %v1749_v25 }
  0xf6   :  { %v1747_v41 = vpop.f32.mrf.mxu2 }
  0xf7   :  { %v535_v36 = vpop.f32.mrf.mxu0  ;;  %v1727_v37 = vpop.f32.mrf.mxu1  ;;  %902 = vst [vmem:[#allocation3 + $0x160] sm:$0xff] %v1747_v41 }
  0xf8   :  { %871 = vst [vmem:[#allocation3 + $0x68] sm:$0xff] %v535_v36  ;;  %v1004_v13 = vmul.f32 %v535_v36, %v535_v36  ;;  %v934_v29 = vadd.f32 %v933_v9, %v535_v36  ;;  %v1768_v61 = vpop.f32.mrf.mxu3 }
  0xf9   :  { %887 = vst [vmem:[#allocation3 + $0xe8] sm:$0xff] %v1727_v37 }
  0xfa   :  { %v1067_v31 = vadd.f32 %v1066_v17, %v1004_v13  ;;  %915 = vst [vmem:[#allocation3 + $0x1c8] sm:$0xff] %v1768_v61  ;;  %v1013_v13 = vmul.f32 %v1665_v3, %v1665_v3 }
  0xfe   :  { %v1766_v59 = vpop.f32.mrf.mxu2 }
  0xff   :  { %v538_v56 = vpop.f32.mrf.mxu0  ;;  %v1736_v58 = vpop.f32.mrf.mxu1  ;;  %903 = vst [vmem:[#allocation3 + $0x168] sm:$0xff] %v1766_v59 }
 0x100   :  { %872 = vst [vmem:[#allocation3 + $0x70] sm:$0xff] %v538_v56  ;;  %v1005_v30 = vmul.f32 %v538_v56, %v538_v56  ;;  %v935_v21 = vadd.f32 %v934_v29, %v538_v56 }
 0x101   :  { %888 = vst [vmem:[#allocation3 + $0xf0] sm:$0xff] %v1736_v58 }
 0x102   :  { %v1068_v34 = vadd.f32 %v1067_v31, %v1005_v30  ;;  %v1014_v30 = vmul.f32 %v1671_v6, %v1671_v6 }
 0x107   :  { %v540_v32 = vpop.f32.mrf.mxu0  ;;  %v1745_v33 = vpop.f32.mrf.mxu1 }
 0x108   :  { %873 = vst [vmem:[#allocation3 + $0x78] sm:$0xff] %v540_v32  ;;  %v936_v38 = vadd.f32 %v935_v21, %v540_v32  ;;  %v1006_v40 = vmul.f32 %v540_v32, %v540_v32  ;;  %v1784_v21 = vpop.f32.mrf.mxu2  ;;  %v1786_v32 = vpop.f32.mrf.mxu3 }
 0x109   :  { %889 = vst [vmem:[#allocation3 + $0xf8] sm:$0xff] %v1745_v33 }
 0x10a   :  { %v937_v36 = vadd.f32 %v936_v38, %v1618_v35  ;;  %v1069_v46 = vadd.f32 %v1068_v34, %v1006_v40  ;;  %v1010_v35 = vmul.f32 %v1639_v51, %v1639_v51  ;;  %904 = vst [vmem:[#allocation3 + $0x170] sm:$0xff] %v1784_v21 }
 0x10b   :  { %916 = vst [vmem:[#allocation3 + $0x1d0] sm:$0xff] %v1786_v32 }
 0x10c   :  { %v938_v48 = vadd.f32 %v937_v36, %v1629_v39  ;;  %v1070_v49 = vadd.f32 %v1069_v46, %v1007_v44  ;;  %v1011_v39 = vmul.f32 %v1645_v57, %v1645_v57  ;;  %v1017_v44 = vmul.f32 %v1698_v18, %v1698_v18 }
 0x10e   :  { %v939_v52 = vadd.f32 %v938_v48, %v1632_v45  ;;  %v1071_v53 = vadd.f32 %v1070_v49, %v1008_v47  ;;  %v1012_v45 = vmul.f32 %v1659_v0, %v1659_v0  ;;  %v1018_v47 = vmul.f32 %v1707_v22, %v1707_v22 }
 0x110   :  { %v940_v55 = vadd.f32 %v939_v52, %v1639_v51  ;;  %v1072_v56 = vadd.f32 %v1071_v53, %v1009_v50  ;;  %v1802_v49 = vpop.f32.mrf.mxu2  ;;  %v1804_v50 = vpop.f32.mrf.mxu3  ;;  %v1019_v52 = vmul.f32 %v1716_v26, %v1716_v26 }
 0x111   :  { %905 = vst [vmem:[#allocation3 + $0x178] sm:$0xff] %v1802_v49 }
 0x112   :  { %v941_v62 = vadd.f32 %v940_v55, %v1645_v57  ;;  %v1073_v5 = vadd.f32 %v1072_v56, %v1010_v35  ;;  %917 = vst [vmem:[#allocation3 + $0x1d8] sm:$0xff] %v1804_v50 }
 0x114   :  { %v942_v51 = vadd.f32 %v941_v62, %v1659_v0  ;;  %v1074_v9 = vadd.f32 %v1073_v5, %v1011_v39  ;;  %v1015_v0 = vmul.f32 %v1680_v10, %v1680_v10  ;;  %v1021_v39 = vmul.f32 %v1736_v58, %v1736_v58 }
 0x116   :  { %v1075_v17 = vadd.f32 %v1074_v9, %v1012_v45  ;;  %v943_v29 = vadd.f32 %v942_v51, %v1665_v3  ;;  %v1016_v3 = vmul.f32 %v1689_v14, %v1689_v14  ;;  %v1023_v51 = vmul.f32 %v1641_v54, %v1641_v54 }
 0x118   :  { %v944_v57 = vadd.f32 %v943_v29, %v1671_v6  ;;  %v1076_v31 = vadd.f32 %v1075_v17, %v1013_v13  ;;  %v1820_v45 = vpop.f32.mrf.mxu3  ;;  %v1024_v13 = vmul.f32 %v1649_v60, %v1649_v60  ;;  %v1025_v29 = vmul.f32 %v1661_v1, %v1661_v1 }
 0x119   :  { %918 = vst [vmem:[#allocation3 + $0x1e0] sm:$0xff] %v1820_v45 }
 0x11a   :  { %v945_v34 = vadd.f32 %v944_v57, %v1680_v10  ;;  %v1077_v38 = vadd.f32 %v1076_v31, %v1014_v30  ;;  %v1026_v57 = vmul.f32 %v1667_v4, %v1667_v4 }
 0x11c   :  { %v946_v6 = vadd.f32 %v945_v34, %v1689_v14  ;;  %v1078_v40 = vadd.f32 %v1077_v38, %v1015_v0 }
 0x11e   :  { %v947_v36 = vadd.f32 %v946_v6, %v1698_v18  ;;  %v1079_v46 = vadd.f32 %v1078_v40, %v1016_v3 }
 0x120   :  { %v948_v10 = vadd.f32 %v947_v36, %v1707_v22  ;;  %v1080_v48 = vadd.f32 %v1079_v46, %v1017_v44  ;;  %v1020_v22 = vmul.f32 %v1727_v37, %v1727_v37  ;;  %v1030_v36 = vmul.f32 %v1700_v19, %v1700_v19 }
 0x122   :  { %v949_v14 = vadd.f32 %v948_v10, %v1716_v26  ;;  %v1081_v53 = vadd.f32 %v1080_v48, %v1018_v47  ;;  %v1022_v26 = vmul.f32 %v1745_v33, %v1745_v33 }
 0x124   :  { %v1082_v18 = vadd.f32 %v1081_v53, %v1019_v52  ;;  %v950_v35 = vadd.f32 %v949_v14, %v1727_v37  ;;  %v1033_v52 = vmul.f32 %v1729_v42, %v1729_v42 }
 0x126   :  { %v1083_v55 = vadd.f32 %v1082_v18, %v1020_v22  ;;  %v951_v56 = vadd.f32 %v950_v35, %v1736_v58  ;;  %v1034_v35 = vmul.f32 %v1738_v63, %v1738_v63 }
 0x128   :  { %v1084_v62 = vadd.f32 %v1083_v55, %v1021_v39  ;;  %v952_v5 = vadd.f32 %v951_v56, %v1745_v33  ;;  %v1035_v39 = vmul.f32 %v1747_v41, %v1747_v41 }
 0x12a   :  { %v953_v37 = vadd.f32 %v952_v5, %v1641_v54  ;;  %v1085_v9 = vadd.f32 %v1084_v62, %v1022_v26  ;;  %v1835_v54 = vpop.f32.mrf.mxu3 }
 0x12b   :  { %919 = vst [vmem:[#allocation3 + $0x1e8] sm:$0xff] %v1835_v54 }
 0x12c   :  { %v954_v58 = vadd.f32 %v953_v37, %v1649_v60  ;;  %v1086_v17 = vadd.f32 %v1085_v9, %v1023_v51  ;;  %v1027_v60 = vmul.f32 %v1673_v7, %v1673_v7  ;;  %v1037_v51 = vmul.f32 %v1784_v21, %v1784_v21 }
 0x12e   :  { %v955_v33 = vadd.f32 %v954_v58, %v1661_v1  ;;  %v1087_v30 = vadd.f32 %v1086_v17, %v1024_v13  ;;  %v1028_v1 = vmul.f32 %v1682_v11, %v1682_v11  ;;  %v1039_v13 = vmul.f32 %v1675_v8, %v1675_v8 }
 0x130   :  { %v956_v31 = vadd.f32 %v955_v33, %v1667_v4  ;;  %v1088_v0 = vadd.f32 %v1087_v30, %v1025_v29  ;;  %v1029_v4 = vmul.f32 %v1691_v15, %v1691_v15 }
 0x132   :  { %v957_v34 = vadd.f32 %v956_v31, %v1673_v7  ;;  %v1089_v38 = vadd.f32 %v1088_v0, %v1026_v57  ;;  %v1850_v7 = vpop.f32.mrf.mxu3 }
 0x133   :  { %920 = vst [vmem:[#allocation3 + $0x1f0] sm:$0xff] %v1850_v7 }
 0x134   :  { %v958_v3 = vadd.f32 %v957_v34, %v1682_v11  ;;  %v1090_v6 = vadd.f32 %v1089_v38, %v1027_v60  ;;  %v1031_v11 = vmul.f32 %v1709_v23, %v1709_v23 }
 0x136   :  { %v1091_v40 = vadd.f32 %v1090_v6, %v1028_v1  ;;  %v959_v44 = vadd.f32 %v958_v3, %v1691_v15  ;;  %v1032_v15 = vmul.f32 %v1718_v27, %v1718_v27 }
 0x138   :  { %v960_v46 = vadd.f32 %v959_v44, %v1700_v19  ;;  %v1092_v47 = vadd.f32 %v1091_v40, %v1029_v4 }
 0x13a   :  { %v961_v10 = vadd.f32 %v960_v46, %v1709_v23  ;;  %v1093_v48 = vadd.f32 %v1092_v47, %v1030_v36  ;;  %v1868_v55 = vpop.f32.mrf.mxu3 }
 0x13b   :  { %921 = vst [vmem:[#allocation3 + $0x1f8] sm:$0xff] %v1868_v55 }
 0x13c   :  { %v962_v19 = vadd.f32 %v961_v10, %v1718_v27  ;;  %v1094_v14 = vadd.f32 %v1093_v48, %v1031_v11  ;;  %1138 = dma.vmem_to_hbm [thread:$0]  %s1131_s30, 8192, %s1133_s7, [#allocation4], %s1468_s2, %s1468_s2, %s1469_s8   ;;  %v1050_v48 = vmul.f32 %v1804_v50, %v1804_v50 }
 0x13e   :  { %v963_v53 = vadd.f32 %v962_v19, %v1729_v42  ;;  %v1095_v18 = vadd.f32 %v1094_v14, %v1032_v15  ;;  %v1051_v14 = vmul.f32 %v1820_v45, %v1820_v45 }
 0x140   :  { %v964_v23 = vadd.f32 %v963_v53, %v1738_v63  ;;  %v1096_v22 = vadd.f32 %v1095_v18, %v1033_v52  ;;  %v1036_v63 = vmul.f32 %v1766_v59, %v1766_v59  ;;  %v1052_v53 = vmul.f32 %v1835_v54, %v1835_v54 }
 0x142   :  { %v1097_v27 = vadd.f32 %v1096_v22, %v1034_v35  ;;  %v965_v56 = vadd.f32 %v964_v23, %v1747_v41  ;;  %v1038_v41 = vmul.f32 %v1802_v49, %v1802_v49  ;;  %v1053_v23 = vmul.f32 %v1850_v7, %v1850_v7 }
 0x143   :  { %v1054_v22 = vmul.f32 %v1868_v55, %v1868_v55 }
 0x144   :  { %v1098_v42 = vadd.f32 %v1097_v27, %v1035_v39  ;;  %v966_v62 = vadd.f32 %v965_v56, %v1766_v59  ;;  %v1040_v59 = vmul.f32 %v1684_v12, %v1684_v12 }
 0x146   :  { %v1099_v5 = vadd.f32 %v1098_v42, %v1036_v63  ;;  %v967_v26 = vadd.f32 %v966_v62, %v1784_v21  ;;  %v1041_v21 = vmul.f32 %v1693_v16, %v1693_v16 }
 0x148   :  { %v1100_v37 = vadd.f32 %v1099_v5, %v1037_v51  ;;  %v968_v9 = vadd.f32 %v967_v26, %v1802_v49  ;;  %v1042_v49 = vmul.f32 %v1702_v20, %v1702_v20 }
 0x14a   :  { %v969_v58 = vadd.f32 %v968_v9, %v1675_v8  ;;  %v1101_v17 = vadd.f32 %v1100_v37, %v1038_v41  ;;  %v1043_v8 = vmul.f32 %v1711_v24, %v1711_v24 }
 0x14c   :  { %v970_v29 = vadd.f32 %v969_v58, %v1684_v12  ;;  %v1102_v33 = vadd.f32 %v1101_v17, %v1039_v13  ;;  %v1044_v12 = vmul.f32 %v1720_v28, %v1720_v28 }
 0x14e   :  { %v971_v30 = vadd.f32 %v970_v29, %v1693_v16  ;;  %v1103_v57 = vadd.f32 %v1102_v33, %v1040_v59  ;;  %v1045_v16 = vmul.f32 %v1731_v43, %v1731_v43 }
 0x150   :  { %v972_v31 = vadd.f32 %v971_v30, %v1702_v20  ;;  %v1104_v0 = vadd.f32 %v1103_v57, %v1041_v21  ;;  %v1046_v20 = vmul.f32 %v1740_v2, %v1740_v2 }
 0x152   :  { %v973_v60 = vadd.f32 %v972_v31, %v1711_v24  ;;  %v1105_v34 = vadd.f32 %v1104_v0, %v1042_v49  ;;  %v1047_v24 = vmul.f32 %v1749_v25, %v1749_v25 }
 0x154   :  { %v974_v38 = vadd.f32 %v973_v60, %v1720_v28  ;;  %v1106_v1 = vadd.f32 %v1105_v34, %v1043_v8  ;;  %v1048_v28 = vmul.f32 %v1768_v61, %v1768_v61 }
 0x156   :  { %v1107_v3 = vadd.f32 %v1106_v1, %v1044_v12  ;;  %v975_v6 = vadd.f32 %v974_v38, %v1731_v43  ;;  %v1049_v43 = vmul.f32 %v1786_v32, %v1786_v32 }
 0x158   :  { %v976_v4 = vadd.f32 %v975_v6, %v1740_v2  ;;  %v1108_v40 = vadd.f32 %v1107_v3, %v1045_v16 }
 0x15a   :  { %v977_v44 = vadd.f32 %v976_v4, %v1749_v25  ;;  %v1109_v36 = vadd.f32 %v1108_v40, %v1046_v20 }
 0x15c   :  { %v978_v46 = vadd.f32 %v977_v44, %v1768_v61  ;;  %v1110_v47 = vadd.f32 %v1109_v36, %v1047_v24 }
 0x15e   :  { %v979_v11 = vadd.f32 %v978_v46, %v1786_v32  ;;  %v1111_v10 = vadd.f32 %v1110_v47, %v1048_v28 }
 0x160   :  { %v980_v2 = vadd.f32 %v979_v11, %v1804_v50  ;;  %v1112_v15 = vadd.f32 %v1111_v10, %v1049_v43 }
 0x162   :  { %v1113_v25 = vadd.f32 %v1112_v15, %v1050_v48  ;;  %v981_v19 = vadd.f32 %v980_v2, %v1820_v45 }
 0x164   :  { %v1114_v61 = vadd.f32 %v1113_v25, %v1051_v14  ;;  %v982_v52 = vadd.f32 %v981_v19, %v1835_v54 }
 0x166   :  { %v1115_v32 = vadd.f32 %v1114_v61, %v1052_v53  ;;  %v983_v18 = vadd.f32 %v982_v52, %v1850_v7 }
 0x168   :  { %v1116_v50 = vadd.f32 %v1115_v32, %v1053_v23  ;;  %v984_v35 = vadd.f32 %v983_v18, %v1868_v55 }
 0x16a   :  { %v985_v27 = vrot.slane %v984_v35, 4  ;;  %v1117_v45 = vadd.f32 %v1116_v50, %v1054_v22 }
 0x16c   :  { %v986_v56 = vadd.f32 %v985_v27, %v984_v35  ;;  %v1118_v39 = vrot.slane %v1117_v45, 4 }
 0x16e   :  { %v987_v42 = vrot.slane %v986_v56, 2  ;;  %v1119_v62 = vadd.f32 %v1118_v39, %v1117_v45 }
 0x170   :  { %v988_v63 = vadd.f32 %v987_v42, %v986_v56  ;;  %v1120_v54 = vrot.slane %v1119_v62, 2 }
 0x172   :  { %v989_v7 = vrot.slane %v988_v63, 1  ;;  %v1121_v5 = vadd.f32 %v1120_v54, %v1119_v62 }
 0x174   :  { %v990_v55 = vadd.f32 %v989_v7, %v988_v63  ;;  %v1122_v26 = vrot.slane %v1121_v5, 1 }
 0x176   :  { %1124 = vst [vmem:[#allocation5] sm:$0xff] %v990_v55  ;;  %v1123_v51 = vadd.f32 %v1122_v26, %v1121_v5 }
 0x177   :  { %1149 = dma.vmem_to_hbm [thread:$0]  %s1145_s10, 128, %s1147_s13, [#allocation6]  }
 0x178   :  { %1125 = vst [vmem:[#allocation7] sm:$0xff] %v1123_v51 }
 0x179   :  { %1160 = dma.vmem_to_hbm [thread:$0]  %s1156_s15, 128, %s1158_s18, [#allocation6]  }
 0x17a   :  { %1463 = dma.done.wait [#allocation4], 8192  }
 0x17b   :  { %1464 = vsyncadd [#allocation4], 4294959104 }
 0x17c   :  { %1465 = dma.done.wait [#allocation6], 256  }
 0x17d   :  { %1466 = vsyncadd [#allocation6], 4294967040 }
 0x17e   :  { %1173 = vsyncpa [#allocation4], 1 }
 0x17f   :  { %1174 = vsyncpa [#allocation6], 1 }

</bundles_post_ra>
